<compile_context>
chip_gen: v7x
topology: tpu7x:2x2x1
jax: 0.10.0
libtpu: 0.0.40
codegen_flags: <defaults>
</compile_context>

<pallas_src>
import jax
import jax.numpy as jnp
from jax import lax
from jax.experimental import pallas as pl
from jax.experimental.pallas import tpu as pltpu


def _round_up(x, m):
    return (x + m - 1) // m * m


def _critic_mlp_kernel(x_ref, w1_ref, b1_ref, w2_ref, b2_ref, w3_ref, b3_ref,
                       q_ref):
    # x_ref: (TILE_N, D_IN) bf16, already [obs | actions] fused.
    x = x_ref[...]

    # fc1: bf16 operands -> f32 accumulation (single-pass MXU rate);
    # bias + relu on the VPU in f32.
    h1 = jnp.dot(x, w1_ref[...], preferred_element_type=jnp.float32)
    h1 = jnp.maximum(h1 + b1_ref[...], 0.0)

    # fc2: same bf16-operand / f32-accumulate scheme.
    h2 = jnp.dot(h1.astype(jnp.bfloat16), w2_ref[...],
                 preferred_element_type=jnp.float32)
    h2 = jnp.maximum(h2 + b2_ref[...], 0.0)

    # fc3 as an NT matmul contracting the hidden dim of both operands:
    # (1, Hp) x (TILE_N, Hp)^T -> (1, TILE_N).  The result is lane-dense, so
    # the output store is a full-lane vst (no masked 1-lane column store) and
    # the writeback DMA carries no padding.  M=1 makes its MXU cost negligible.
    q = lax.dot_general(w3_ref[...], h2,
                        dimension_numbers=(((1,), (1,)), ((), ())),
                        preferred_element_type=jnp.float32)
    q = q + b3_ref[...]
    q_ref[...] = q[None].astype(q_ref.dtype)      # (1, 1, TILE_N) block


def pevfa_facmac_critic_forward(inputs, actions, params, *, obs_shape,
                                n_actions, hidden_state=None, tile_n=2048):
    """JAX wrapper mirroring PeVFA_FACMACDiscreteCritic.forward."""
    w1, b1, w2, b2, w3, b3 = params
    hidden = w1.shape[1]
    d_in = obs_shape + n_actions
    h_pad = _round_up(max(hidden, 1), 128)
    pad_h = h_pad - hidden

    # Zero-pad the hidden (lane) dim to a multiple of 128 (exact: padded
    # h1/h2 lanes are relu(0)=0, padded w2/w3 rows are 0).  Only the MXU
    # operands (x, w1, w2) go bf16; biases, fc3 weight and all VPU math
    # stay f32.
    w1p = jnp.pad(w1.astype(jnp.float32), ((0, 0), (0, pad_h))).astype(jnp.bfloat16)
    b1p = jnp.pad(b1.astype(jnp.float32).reshape(1, -1), ((0, 0), (0, pad_h)))
    w2p = jnp.pad(w2.astype(jnp.float32), ((0, pad_h), (0, pad_h))).astype(jnp.bfloat16)
    b2p = jnp.pad(b2.astype(jnp.float32).reshape(1, -1), ((0, 0), (0, pad_h)))
    w3r = jnp.pad(w3.astype(jnp.float32).reshape(1, -1), ((0, 0), (0, pad_h)))
    b3p = b3.astype(jnp.float32).reshape(1, 1)

    # Fused [obs | actions] input -> a single K=d_in fc1 matmul.  The wrapper
    # concat's extra HBM pass is hidden under MXU time on v6e/v7x and the
    # bf16 cast halves its size anyway.
    if actions is not None:
        x = jnp.concatenate(
            [inputs.reshape(-1, obs_shape), actions.reshape(-1, n_actions)],
            axis=-1)
    else:
        x = inputs.reshape(-1, d_in)
    x = x.astype(jnp.bfloat16)
    n_rows = x.shape[0]

    # Row tile: multiple of 128.  Guarantee >=2 tiles whenever there is more
    # than one tile's worth of rows, so the "parallel" grid axis feeds both
    # v7x TensorCores (harmless no-op on single-TC v5e/v6e).
    tile_n = max(128, _round_up(int(tile_n), 128))
    if _round_up(max(n_rows, 1), 128) > 128:
        tile_n = min(tile_n, _round_up((n_rows + 1) // 2, 128))
    else:
        tile_n = 128
    n_pad = _round_up(max(n_rows, 1), tile_n)
    num_tiles = n_pad // tile_n
    if n_pad != n_rows:
        x = jnp.pad(x, ((0, n_pad - n_rows), (0, 0)))

    q_pad = pl.pallas_call(
        _critic_mlp_kernel,
        out_shape=jax.ShapeDtypeStruct((num_tiles, 1, tile_n), jnp.float32),
        grid=(num_tiles,),
        in_specs=[
            # Row-tiled fused input (pipelined / double-buffered).
            pl.BlockSpec((tile_n, d_in), lambda i: (i, 0)),
            # Weights / biases: constant block index -> resident in VMEM
            # (no re-DMA across row tiles).
            pl.BlockSpec((d_in, h_pad), lambda i: (0, 0)),
            pl.BlockSpec((1, h_pad), lambda i: (0, 0)),
            pl.BlockSpec((h_pad, h_pad), lambda i: (0, 0)),
            pl.BlockSpec((1, h_pad), lambda i: (0, 0)),
            pl.BlockSpec((1, h_pad), lambda i: (0, 0)),
            pl.BlockSpec((1, 1), lambda i: (0, 0)),
        ],
        # Lane-dense output: one (1, tile_n) row per grid step.
        out_specs=pl.BlockSpec((1, 1, tile_n), lambda i: (i, 0, 0)),
        compiler_params=pltpu.CompilerParams(
            dimension_semantics=("parallel",),      # megacore split on v7x
            # ~3-4 MB working set at tile_n=2048: far under v7x's 64 MiB
            # physical VMEM, so the conservative 32 MiB limit is safe on
            # every generation.
            vmem_limit_bytes=32 * 1024 * 1024,
        ),
    )(x, w1p, b1p, w2p, b2p, w3r, b3p)

    q = q_pad.reshape(-1)[:n_rows].reshape(-1, 1)
    if actions is None:
        q = q.reshape(inputs.shape[:-1] + (1,))
    return q, hidden_state


def make_params(key, obs_shape, n_actions, hidden):
    """Deterministic synthetic parameters (stand-in for nn.Linear weights)."""
    d_in = obs_shape + n_actions
    k1, k2, k3, k4, k5, k6 = jax.random.split(key, 6)
    w1 = jax.random.normal(k1, (d_in, hidden), jnp.float32) * 0.1
    b1 = jax.random.normal(k2, (1, hidden), jnp.float32) * 0.1
    w2 = jax.random.normal(k3, (hidden, hidden), jnp.float32) * 0.1
    b2 = jax.random.normal(k4, (1, hidden), jnp.float32) * 0.1
    w3 = jax.random.normal(k5, (hidden, 1), jnp.float32) * 0.1
    b3 = jax.random.normal(k6, (1, 1), jnp.float32) * 0.1
    return (w1, b1, w2, b2, w3, b3)


def _reference_forward(inputs, actions, params, obs_shape, n_actions):
    """Pure-JAX f32 reference of the PyTorch forward."""
    w1, b1, w2, b2, w3, b3 = params
    x = jnp.concatenate(
        [inputs.reshape(-1, obs_shape), actions.reshape(-1, n_actions)], -1)
    h1 = jax.nn.relu(x @ w1 + b1)
    h2 = jax.nn.relu(h1 @ w2 + b2)
    return h2 @ w3 + b3


if __name__ == "__main__":
    # Shapes consistent with the module:
    #   scheme['obs']['vshape'] = 28, n_actions = 4 -> input_shape = 32
    #   args.rnn_hidden_dim = 32
    obs_shape, n_actions, hidden = 28, 4, 32
    key = jax.random.PRNGKey(0)
    kp, ki, ka, ki2, ka2 = jax.random.split(key, 5)
    params = make_params(kp, obs_shape, n_actions, hidden)

    # bf16 MXU operands with f32 accumulation -> loosened tolerance.
    TOL = dict(atol=3e-2, rtol=3e-2)

    # Case 1: tiny batch (single tile, rows padded 8 -> 128).
    batch, n_agents = 4, 2
    inputs = jax.random.normal(ki, (batch, n_agents, obs_shape), jnp.float32)
    actions = jax.random.normal(ka, (batch, n_agents, n_actions), jnp.float32)
    q, h = pevfa_facmac_critic_forward(
        inputs, actions, params,
        obs_shape=obs_shape, n_actions=n_actions, hidden_state=None)
    q = jax.block_until_ready(q)
    q_ref = _reference_forward(inputs, actions, params, obs_shape, n_actions)
    assert q.shape == (batch * n_agents, 1), q.shape
    assert h is None
    assert jnp.allclose(q, q_ref, **TOL), "mismatch (case 1)"

    # Case 1b: actions-is-None path (pre-fused input), must match case 1.
    x_cat = jnp.concatenate(
        [inputs.reshape(-1, obs_shape), actions.reshape(-1, n_actions)], -1)
    q_none, _ = pevfa_facmac_critic_forward(
        x_cat, None, params,
        obs_shape=obs_shape, n_actions=n_actions, hidden_state=None)
    q_none = jax.block_until_ready(q_none)
    assert q_none.shape == (batch * n_agents, 1), q_none.shape
    assert jnp.allclose(q_none, q, atol=1e-6, rtol=1e-6), "mismatch (case 1b)"

    # Case 2: multi-tile grid with ragged last tile (200 rows, TILE_N=128).
    batch2, n_agents2 = 25, 8
    inputs2 = jax.random.normal(ki2, (batch2, n_agents2, obs_shape), jnp.float32)
    actions2 = jax.random.normal(ka2, (batch2, n_agents2, n_actions), jnp.float32)
    q2, _ = pevfa_facmac_critic_forward(
        inputs2, actions2, params,
        obs_shape=obs_shape, n_actions=n_actions, hidden_state=None, tile_n=128)
    q2 = jax.block_until_ready(q2)
    q2_ref = _reference_forward(inputs2, actions2, params, obs_shape, n_actions)
    assert q2.shape == (batch2 * n_agents2, 1), q2.shape
    assert jnp.allclose(q2, q2_ref, **TOL), "mismatch (case 2)"

    print("KERNEL_OK")
</pallas_src>

<mosaic_0001>
module attributes {stable_mosaic.version = 11 : i64} {
  func.func @_critic_mlp_kernel(%arg0: i32, %arg1: memref<128x32xbf16, #tpu.memory_space<vmem>>, %arg2: memref<32x128xbf16, #tpu.memory_space<vmem>>, %arg3: memref<1x128xf32, #tpu.memory_space<vmem>>, %arg4: memref<128x128xbf16, #tpu.memory_space<vmem>>, %arg5: memref<1x128xf32, #tpu.memory_space<vmem>>, %arg6: memref<1x128xf32, #tpu.memory_space<vmem>>, %arg7: memref<1x1xf32, #tpu.memory_space<vmem>>, %arg8: memref<1x1x128xf32, #tpu.memory_space<vmem>>) attributes {dimension_semantics = [#tpu.dimension_semantics<parallel>], iteration_bounds = array<i64: 1>, scalar_prefetch = 0 : i64, scratch_operands = 0 : i64, tpu.core_type = #tpu.core_type<tc>, window_params = [{transform_indices = @transform_0, window_bounds = array<i64: 128, 32>}, {pipeline_mode = #tpu.pipeline_mode<synchronous>, transform_indices = @transform_1, window_bounds = array<i64: 32, 128>}, {pipeline_mode = #tpu.pipeline_mode<synchronous>, transform_indices = @transform_2, window_bounds = array<i64: 1, 128>}, {pipeline_mode = #tpu.pipeline_mode<synchronous>, transform_indices = @transform_3, window_bounds = array<i64: 128, 128>}, {pipeline_mode = #tpu.pipeline_mode<synchronous>, transform_indices = @transform_4, window_bounds = array<i64: 1, 128>}, {pipeline_mode = #tpu.pipeline_mode<synchronous>, transform_indices = @transform_5, window_bounds = array<i64: 1, 128>}, {pipeline_mode = #tpu.pipeline_mode<synchronous>, transform_indices = @transform_6, window_bounds = array<i64: 1, 1>}, {transform_indices = @transform_7, window_bounds = array<i64: 1, 1, 128>}]} {
    %c0 = arith.constant 0 : index
    %c0_0 = arith.constant 0 : index
    %0 = vector.load %arg1[%c0, %c0_0] : memref<128x32xbf16, #tpu.memory_space<vmem>>, vector<128x32xbf16>
    %c0_1 = arith.constant 0 : index
    %c0_2 = arith.constant 0 : index
    %1 = vector.load %arg2[%c0_1, %c0_2] : memref<32x128xbf16, #tpu.memory_space<vmem>>, vector<32x128xbf16>
    %cst = arith.constant dense<0.000000e+00> : vector<128x128xf32>
    %2 = tpu.matmul %0, %1, %cst {dimension_numbers = #tpu.dot_dimension_numbers<[1], [0], [0], [1], [0, 0, 1, 1], [], []>} : vector<128x32xbf16>, vector<32x128xbf16>, vector<128x128xf32> -> vector<128x128xf32>
    %c0_3 = arith.constant 0 : index
    %c0_4 = arith.constant 0 : index
    %3 = vector.load %arg3[%c0_3, %c0_4] : memref<1x128xf32, #tpu.memory_space<vmem>>, vector<1x128xf32>
    %4 = vector.broadcast %3 : vector<1x128xf32> to vector<128x128xf32>
    %5 = arith.addf %2, %4 : vector<128x128xf32>
    %cst_5 = arith.constant 0.000000e+00 : f32
    %6 = vector.broadcast %cst_5 : f32 to vector<128x128xf32>
    %7 = arith.maximumf %5, %6 : vector<128x128xf32>
    %8 = arith.truncf %7 : vector<128x128xf32> to vector<128x128xbf16>
    %c0_6 = arith.constant 0 : index
    %c0_7 = arith.constant 0 : index
    %9 = vector.load %arg4[%c0_6, %c0_7] : memref<128x128xbf16, #tpu.memory_space<vmem>>, vector<128x128xbf16>
    %cst_8 = arith.constant dense<0.000000e+00> : vector<128x128xf32>
    %10 = tpu.matmul %8, %9, %cst_8 {dimension_numbers = #tpu.dot_dimension_numbers<[1], [0], [0], [1], [0, 0, 1, 1], [], []>} : vector<128x128xbf16>, vector<128x128xbf16>, vector<128x128xf32> -> vector<128x128xf32>
    %c0_9 = arith.constant 0 : index
    %c0_10 = arith.constant 0 : index
    %11 = vector.load %arg5[%c0_9, %c0_10] : memref<1x128xf32, #tpu.memory_space<vmem>>, vector<1x128xf32>
    %12 = vector.broadcast %11 : vector<1x128xf32> to vector<128x128xf32>
    %13 = arith.addf %10, %12 : vector<128x128xf32>
    %cst_11 = arith.constant 0.000000e+00 : f32
    %14 = vector.broadcast %cst_11 : f32 to vector<128x128xf32>
    %15 = arith.maximumf %13, %14 : vector<128x128xf32>
    %c0_12 = arith.constant 0 : index
    %c0_13 = arith.constant 0 : index
    %16 = vector.load %arg6[%c0_12, %c0_13] : memref<1x128xf32, #tpu.memory_space<vmem>>, vector<1x128xf32>
    %cst_14 = arith.constant dense<0.000000e+00> : vector<1x128xf32>
    %17 = tpu.matmul %16, %15, %cst_14 {dimension_numbers = #tpu.dot_dimension_numbers<[1], [1], [0], [0], [0, 0, 1, 0], [], []>} : vector<1x128xf32>, vector<128x128xf32>, vector<1x128xf32> -> vector<1x128xf32>
    %c0_15 = arith.constant 0 : index
    %c0_16 = arith.constant 0 : index
    %18 = vector.load %arg7[%c0_15, %c0_16] : memref<1x1xf32, #tpu.memory_space<vmem>>, vector<1x1xf32>
    %19 = vector.broadcast %18 : vector<1x1xf32> to vector<1x128xf32>
    %20 = arith.addf %17, %19 : vector<1x128xf32>
    %21 = vector.shape_cast %20 : vector<1x128xf32> to vector<1x1x128xf32>
    %c0_17 = arith.constant 0 : index
    %c0_18 = arith.constant 0 : index
    %c0_19 = arith.constant 0 : index
    %22 = vector.load %arg8[%c0_17, %c0_18, %c0_19] : memref<1x1x128xf32, #tpu.memory_space<vmem>>, vector<1x1x128xf32>
    tpu.vector_store %arg8[%c0_17, %c0_18, %c0_19], %21 {strides = array<i32>} : memref<1x1x128xf32, #tpu.memory_space<vmem>>, vector<1x1x128xf32>,
    return
  }
  func.func @transform_0(%arg0: i32) -> (i32, i32) {
    %c0_i32 = arith.constant 0 : i32
    %c0_i32_0 = arith.constant 0 : i32
    return %arg0, %c0_i32 : i32, i32
  }
  func.func @transform_1(%arg0: i32) -> (i32, i32) {
    %c0_i32 = arith.constant 0 : i32
    %c0_i32_0 = arith.constant 0 : i32
    %c0_i32_1 = arith.constant 0 : i32
    return %c0_i32, %c0_i32_0 : i32, i32
  }
  func.func @transform_2(%arg0: i32) -> (i32, i32) {
    %c0_i32 = arith.constant 0 : i32
    %c0_i32_0 = arith.constant 0 : i32
    %c0_i32_1 = arith.constant 0 : i32
    return %c0_i32, %c0_i32_0 : i32, i32
  }
  func.func @transform_3(%arg0: i32) -> (i32, i32) {
    %c0_i32 = arith.constant 0 : i32
    %c0_i32_0 = arith.constant 0 : i32
    %c0_i32_1 = arith.constant 0 : i32
    return %c0_i32, %c0_i32_0 : i32, i32
  }
  func.func @transform_4(%arg0: i32) -> (i32, i32) {
    %c0_i32 = arith.constant 0 : i32
    %c0_i32_0 = arith.constant 0 : i32
    %c0_i32_1 = arith.constant 0 : i32
    return %c0_i32, %c0_i32_0 : i32, i32
  }
  func.func @transform_5(%arg0: i32) -> (i32, i32) {
    %c0_i32 = arith.constant 0 : i32
    %c0_i32_0 = arith.constant 0 : i32
    %c0_i32_1 = arith.constant 0 : i32
    return %c0_i32, %c0_i32_0 : i32, i32
  }
  func.func @transform_6(%arg0: i32) -> (i32, i32) {
    %c0_i32 = arith.constant 0 : i32
    %c0_i32_0 = arith.constant 0 : i32
    %c0_i32_1 = arith.constant 0 : i32
    return %c0_i32, %c0_i32_0 : i32, i32
  }
  func.func @transform_7(%arg0: i32) -> (i32, i32, i32) {
    %c0_i32 = arith.constant 0 : i32
    %c0_i32_0 = arith.constant 0 : i32
    %c0_i32_1 = arith.constant 0 : i32
    return %arg0, %c0_i32, %c0_i32_0 : i32, i32, i32
  }
}

</mosaic_0001>

<bundles_post_ra>
// kernel: tpu_custom_call.1
= control target key start
LH: loop header
LB: loop body
LE: loop exit
PB: predicated region body
PF: predicated region fallthrough
CT: control target
= control target key end

     0   :  { %s904_s0 = inlined_call_operand.vmem [shape: bf16[128,32], index: 0, kind: input, shape index: {}]   ;;  %s905_s1 = inlined_call_operand.vmem [shape: bf16[32,128], index: 1, kind: input, shape index: {}]   ;;  %s906_s2 = inlined_call_operand.vmem [shape: f32[1,128], index: 2, kind: input, shape index: {}]   ;;  %s907_s3 = inlined_call_operand.vmem [shape: bf16[128,128], index: 3, kind: input, shape index: {}]   ;;  %s908_s4 = inlined_call_operand.vmem [shape: f32[1,128], index: 4, kind: input, shape index: {}]   ;;  %s909_s5 = inlined_call_operand.vmem [shape: f32[1,128], index: 5, kind: input, shape index: {}]   ;;  %s910_s6 = inlined_call_operand.<no memory space> [shape: f32[1,1], index: 6, kind: input, shape index: {}]   ;;  %s911_s7 = inlined_call_operand.hbm [shape: f32[1,1,128], index: 7, kind: output, shape index: {}]  }
   0x1   :  { %v12_v0 = vstv %s910_s6 }
   0x2   :  { %13 = vst [vmem:[#allocation2] sm:$0x1] %v12_v0 }
   0x3   :  { %v723_v1 = vld [vmem:[%s905_s1] sm:$0xff]   ;;  %v724_v2 = vld [vmem:[%s905_s1 + $0x8] sm:$0xff]   ;;  %vm109_vm0 = vcmask 261120   ;;  %v727_v5 = vld [vmem:[%s904_s0 + $0x10] sm:$0xff]  }
   0x4   :  { %606 = vmatprep.subr.bf16.mxu1 %v723_v1  ;;  %v725_v3 = vld [vmem:[%s904_s0] sm:$0xff]   ;;  %v726_v4 = vld [vmem:[%s904_s0 + $0x8] sm:$0xff]   ;;  %v728_v8 = vld [vmem:[%s904_s0 + $0x18] sm:$0xff]  }
   0x5   :  { %607 = vmatpush3.bf16.msra.mxu1 %v723_v1  ;;  %610 = vmatprep.mubr.msk.bf16.mxu1 %vm109_vm0, %v725_v3  ;;  %v733_v6 = vld [vmem:[%s907_s3] sm:$0xff]   ;;  %v734_v7 = vld [vmem:[%s907_s3 + $0x8] sm:$0xff]   ;;  %v735_v9 = vld [vmem:[%s907_s3 + $0x10] sm:$0xff]  }
   0x6   :  { %608 = vmatprep.subr.bf16.mxu1 %v724_v2  ;;  %v729_v10 = vld [vmem:[%s904_s0 + $0x20] sm:$0xff]  }
   0x9   :  { %609 = vmatpush3.bf16.msra.mxu1 %v724_v2 }
   0xa   :  { %626 = vmatprep.subr.bf16.mxu1 %v733_v6 }
   0xc   :  { %611 = vmatmul.mubr.msk.bf16.vlgmr.msra.gmra.mrb[0].mxu1 %vm109_vm0, %v726_v4 }
   0xd   :  { %614 = vmatprep.mubr.msk.bf16.mxu1 %vm109_vm0, %v727_v5  ;;  %627 = vmatpush3.bf16.msra.mxu1 %v733_v6 }
   0xe   :  { %628 = vmatprep.subr.bf16.mxu1 %v734_v7 }
  0x11   :  { %629 = vmatpush3.bf16.msra.mxu1 %v734_v7 }
  0x12   :  { %14 = vsyncpa [#allocation4], 0  ;;  %630 = vmatprep.subr.bf16.mxu1 %v735_v9  ;;  %v736_v11 = vld [vmem:[%s907_s3 + $0x18] sm:$0xff]   ;;  %v730_v12 = vld [vmem:[%s904_s0 + $0x28] sm:$0xff]   ;;  %vm766_vm1 = vmmov 0   ;;  %s769_s14 = smov [#allocation3]  }
  0x13   :  { %v737_v13 = vld [vmem:[%s907_s3 + $0x20] sm:$0xff]   ;;  %v731_v14 = vld [vmem:[%s904_s0 + $0x30] sm:$0xff]   ;;  %v738_v15 = vld [vmem:[%s907_s3 + $0x28] sm:$0xff]   ;;  %s527_s15 = sshll.u32 %s769_s14, 4  ;;  %s528_s15 = int_to_ptr.vmem [resolvable:$true] %s527_s15 }
  0x14   :  { %615 = vmatmul.mubr.msk.bf16.gmra.mrb[4].mxu1 %vm109_vm0, %v728_v8  ;;  %v732_v16 = vld [vmem:[%s904_s0 + $0x38] sm:$0xff]   ;;  %v739_v17 = vld [vmem:[%s907_s3 + $0x30] sm:$0xff]   ;;  %v535_v19 = vld [vmem:[%s906_s2] ss:$0 sm:$0xff]  ;;  %s741_s16 = scalar_lea.vmem %s528_s15, 16  ;;  %s745_s17 = scalar_lea.vmem %s528_s15, 32 }
  0x15   :  { %618 = vmatprep.mubr.msk.bf16.mxu1 %vm109_vm0, %v729_v10  ;;  %631 = vmatpush3.bf16.msra.mxu1 %v735_v9  ;;  %v740_v18 = vld [vmem:[%s907_s3 + $0x38] sm:$0xff]   ;;  %p742_p0 = scmp.ne.s32.totalorder %s528_s15, %s741_s16  ;;  %p746_p1 = scmp.lt.s32.totalorder %s528_s15, %s528_s15 }
  0x16   :  { %632 = vmatprep.subr.bf16.mxu1 %v736_v11  ;;  %p747_p2 = scmp.lt.s32.totalorder %s745_s17, %s741_s16 }
  0x18   :  { %p748_p3 = por %p747_p2, %p746_p1 }
  0x19   :  { %633 = vmatpush3.bf16.msra.mxu1 %v736_v11 }
  0x1a   :  { %634 = vmatprep.subr.bf16.mxu1 %v737_v13  ;;  %p749_p4 = pnand %p748_p3, %p742_p0 }
  0x1c   :  { %619 = vmatmul.mubr.msk.bf16.gmra.mrb[8].mxu1 %vm109_vm0, %v730_v12  ;;  %v765_v12 = vmov 0.0|0.0  }
  0x1d   :  { %622 = vmatprep.mubr.msk.bf16.mxu1 %vm109_vm0, %v731_v14  ;;  %635 = vmatpush3.bf16.msra.mxu1 %v737_v13  ;;  %v767_v13 = vmov 0.0   ;;  %v440_v14 = vld [vmem:[#allocation2] sm:$0x1] }
  0x1e   :  { %636 = vmatprep.subr.bf16.mxu1 %v738_v15  ;;  %693 = vmatprep.subr.bf16.mxu0 %v765_v12 }
  0x1f   :  { %690 = vmatprep.mubr.msk.f32.mxu0 %vm766_vm1, %v767_v13 }
  0x21   :  { %637 = vmatpush3.bf16.msra.mxu1 %v738_v15  ;;  %v768_v15 = vmov 0  }
  0x22   :  { %638 = vmatprep.subr.bf16.mxu1 %v739_v17  ;;  %722 = vset.pattern.permute.xlu0 %v768_v15 }
  0x23   :  { %443 = vperm.xlu0 %722, %v440_v14  }
  0x24   :  { %623 = vmatmul.mubr.msk.bf16.gmra.mrb[12].mxu1 %vm109_vm0, %v732_v16  ;;  %v554_v16 = vld [vmem:[%s908_s4] ss:$0 sm:$0xff] }
  0x25   :  { %639 = vmatpush3.bf16.msra.mxu1 %v739_v17 }
  0x26   :  { %640 = vmatprep.subr.bf16.mxu1 %v740_v18 }
  0x29   :  { %641 = vmatpush3.bf16.msra.mxu1 %v740_v18 }
  0xa2   :  { %v444_v14 = vpop.permute.xlu0 %443 }
  0xdf   :  { %v612_v20 = vpop.f32.mrb[0].mxu1 }
  0xe0   :  { %v177_v21 = vadd.f32 %v612_v20, %v535_v19  ;;  %v168_v22 = vpop.f32.mrb[1].mxu1 }
  0xe1   :  { %v169_v23 = vadd.f32 %v535_v19, %v168_v22  ;;  %v613_v24 = vpop.f32.mrb[2].mxu1 }
  0xe2   :  { %v180_v25 = vadd.f32 %v613_v24, %v535_v19  ;;  %v171_v26 = vpop.f32.mrb[3].mxu1  ;;  %v233_v28 = vmax.f32 %v177_v21, 0.0 }
  0xe3   :  { %v172_v27 = vadd.f32 %v535_v19, %v171_v26  ;;  %v231_v30 = vmax.f32 %v169_v23, 0.0 }
  0xe4   :  { %v234_v29 = vmax.f32 %v180_v25, 0.0 }
  0xe5   :  { %v232_v31 = vmax.f32 %v172_v27, 0.0 }
  0xe6   :  { %v248_v32 = vpack.c.bf16 %v234_v29, %v233_v28 }
  0xe7   :  { %v247_v33 = vpack.c.bf16 %v232_v31, %v231_v30  ;;  %v616_v34 = vpop.f32.mrb[4].mxu1 }
  0xe8   :  { %v193_v35 = vadd.f32 %v616_v34, %v535_v19  ;;  %v184_v36 = vpop.f32.mrb[5].mxu1 }
  0xe9   :  { %v185_v37 = vadd.f32 %v535_v19, %v184_v36  ;;  %642 = vmatprep.mubr.bf16.mxu1 %v247_v33  ;;  %v617_v38 = vpop.f32.mrb[6].mxu1 }
  0xea   :  { %v237_v39 = vmax.f32 %v193_v35, 0.0  ;;  %v196_v40 = vadd.f32 %v617_v38, %v535_v19  ;;  %643 = vmatmul.mubr.bf16.vlgmr.msra.gmra.mrb[16].mxu1 %v248_v32  ;;  %v187_v41 = vpop.f32.mrb[7].mxu1 }
  0xeb   :  { %v235_v42 = vmax.f32 %v185_v37, 0.0  ;;  %v188_v43 = vadd.f32 %v535_v19, %v187_v41 }
  0xec   :  { %v238_v44 = vmax.f32 %v196_v40, 0.0 }
  0xed   :  { %v236_v45 = vmax.f32 %v188_v43, 0.0 }
  0xee   :  { %v250_v46 = vpack.c.bf16 %v238_v44, %v237_v39 }
  0xef   :  { %v249_v47 = vpack.c.bf16 %v236_v45, %v235_v42  ;;  %v620_v48 = vpop.f32.mrb[8].mxu1 }
  0xf0   :  { %v209_v49 = vadd.f32 %v620_v48, %v535_v19  ;;  %v200_v50 = vpop.f32.mrb[9].mxu1 }
  0xf1   :  { %646 = vmatprep.mubr.bf16.mxu1 %v249_v47  ;;  %v201_v51 = vadd.f32 %v535_v19, %v200_v50  ;;  %v621_v52 = vpop.f32.mrb[10].mxu1 }
  0xf2   :  { %647 = vmatmul.mubr.bf16.gmra.mrb[20].mxu1 %v250_v46  ;;  %v241_v53 = vmax.f32 %v209_v49, 0.0  ;;  %v212_v54 = vadd.f32 %v621_v52, %v535_v19  ;;  %v203_v55 = vpop.f32.mrb[11].mxu1 }
  0xf3   :  { %v239_v56 = vmax.f32 %v201_v51, 0.0  ;;  %v204_v57 = vadd.f32 %v535_v19, %v203_v55 }
  0xf4   :  { %v242_v58 = vmax.f32 %v212_v54, 0.0 }
  0xf5   :  { %v240_v59 = vmax.f32 %v204_v57, 0.0 }
  0xf6   :  { %v252_v60 = vpack.c.bf16 %v242_v58, %v241_v53 }
  0xf7   :  { %v251_v61 = vpack.c.bf16 %v240_v59, %v239_v56  ;;  %v624_v62 = vpop.f32.mrb[12].mxu1 }
  0xf8   :  { %v225_v63 = vadd.f32 %v624_v62, %v535_v19  ;;  %v216_v0 = vpop.f32.mrb[13].mxu1 }
  0xf9   :  { %650 = vmatprep.mubr.bf16.mxu1 %v251_v61  ;;  %v217_v1 = vadd.f32 %v535_v19, %v216_v0  ;;  %v625_v2 = vpop.f32.mrb[14].mxu1 }
  0xfa   :  { %651 = vmatmul.mubr.bf16.gmra.mrb[24].mxu1 %v252_v60  ;;  %v245_v3 = vmax.f32 %v225_v63, 0.0  ;;  %v228_v4 = vadd.f32 %v625_v2, %v535_v19  ;;  %v219_v5 = vpop.f32.mrb[15].mxu1 }
  0xfb   :  { %v243_v6 = vmax.f32 %v217_v1, 0.0  ;;  %v220_v7 = vadd.f32 %v535_v19, %v219_v5 }
  0xfc   :  { %v246_v8 = vmax.f32 %v228_v4, 0.0 }
  0xfd   :  { %v244_v9 = vmax.f32 %v220_v7, 0.0 }
  0xfe   :  { %v254_v10 = vpack.c.bf16 %v246_v8, %v245_v3 }
  0xff   :  { %v253_v11 = vpack.c.bf16 %v244_v9, %v243_v6  ;;  %v439_v9 = vld [vmem:[%s909_s5] sm:$0x1] }
 0x101   :  { %654 = vmatprep.mubr.bf16.mxu1 %v253_v11 }
 0x102   :  { %655 = vmatmul.mubr.bf16.gmra.mrb[28].mxu1 %v254_v10  ;;  %v446_v10 = vlaneseq }
 0x104   :  { %v447_v11 = vshrl.u32 %v446_v10, 7 }
 0x106   :  { %v448_v13 = vsub.s32 0, %v447_v11 }
 0x108   :  { %v449_v15 = vrot.slane %v444_v14, %v448_v13 }
 0x1bd   :  { %v644_v17 = vpop.f32.mrb[16].mxu1 }
 0x1be   :  { %v369_v18 = vadd.f32 %v644_v17, %v554_v16  ;;  %v360_v19 = vpop.f32.mrb[17].mxu1 }
 0x1bf   :  { %v361_v20 = vadd.f32 %v554_v16, %v360_v19  ;;  %v645_v21 = vpop.f32.mrb[18].mxu1 }
 0x1c0   :  { %v372_v22 = vadd.f32 %v645_v21, %v554_v16  ;;  %v363_v23 = vpop.f32.mrb[19].mxu1  ;;  %v425_v25 = vmax.f32 %v369_v18, 0.0 }
 0x1c1   :  { %v364_v24 = vadd.f32 %v554_v16, %v363_v23  ;;  %v423_v27 = vmax.f32 %v361_v20, 0.0 }
 0x1c2   :  { %v426_v26 = vmax.f32 %v372_v22, 0.0 }
 0x1c3   :  { %v424_v28 = vmax.f32 %v364_v24, 0.0 }
 0x1c4   :  { %v697_v29 = vpack.c.bf16 %v426_v26, %v425_v25 }
 0x1c5   :  { %v648_v30 = vpop.f32.mrb[20].mxu1  ;;  %v694_v31 = vpack.c.bf16 %v424_v28, %v423_v27 }
 0x1c6   :  { %v385_v32 = vadd.f32 %v648_v30, %v554_v16  ;;  %v376_v33 = vpop.f32.mrb[21].mxu1 }
 0x1c7   :  { %v377_v34 = vadd.f32 %v554_v16, %v376_v33  ;;  %695 = vmatpush3.bf16.xpose.msra.mxu0 %v694_v31  ;;  %v649_v35 = vpop.f32.mrb[22].mxu1 }
 0x1c8   :  { %v429_v36 = vmax.f32 %v385_v32, 0.0  ;;  %v388_v37 = vadd.f32 %v649_v35, %v554_v16  ;;  %v379_v38 = vpop.f32.mrb[23].mxu1  ;;  %696 = vmatprep.subr.bf16.mxu0 %v765_v12 }
 0x1c9   :  { %v427_v39 = vmax.f32 %v377_v34, 0.0  ;;  %v380_v40 = vadd.f32 %v554_v16, %v379_v38 }
 0x1ca   :  { %v430_v41 = vmax.f32 %v388_v37, 0.0 }
 0x1cb   :  { %v428_v42 = vmax.f32 %v380_v40, 0.0 }
 0x1cc   :  { %v703_v43 = vpack.c.bf16 %v430_v41, %v429_v36 }
 0x1cd   :  { %v700_v44 = vpack.c.bf16 %v428_v42, %v427_v39  ;;  %v652_v45 = vpop.f32.mrb[24].mxu1 }
 0x1ce   :  { %v401_v46 = vadd.f32 %v652_v45, %v554_v16  ;;  %v392_v47 = vpop.f32.mrb[25].mxu1 }
 0x1cf   :  { %698 = vmatpush3.bf16.xpose.msra.mxu0 %v697_v29  ;;  %v393_v48 = vadd.f32 %v554_v16, %v392_v47  ;;  %v653_v49 = vpop.f32.mrb[26].mxu1 }
 0x1d0   :  { %v433_v50 = vmax.f32 %v401_v46, 0.0  ;;  %699 = vmatprep.subr.bf16.mxu0 %v765_v12  ;;  %v404_v51 = vadd.f32 %v653_v49, %v554_v16  ;;  %v395_v52 = vpop.f32.mrb[27].mxu1 }
 0x1d1   :  { %v431_v53 = vmax.f32 %v393_v48, 0.0  ;;  %v396_v54 = vadd.f32 %v554_v16, %v395_v52 }
 0x1d2   :  { %v434_v55 = vmax.f32 %v404_v51, 0.0 }
 0x1d3   :  { %v432_v56 = vmax.f32 %v396_v54, 0.0 }
 0x1d4   :  { %v709_v57 = vpack.c.bf16 %v434_v55, %v433_v50 }
 0x1d5   :  { %v706_v58 = vpack.c.bf16 %v432_v56, %v431_v53  ;;  %v656_v59 = vpop.f32.mrb[28].mxu1 }
 0x1d6   :  { %v417_v60 = vadd.f32 %v656_v59, %v554_v16  ;;  %v408_v61 = vpop.f32.mrb[29].mxu1 }
 0x1d7   :  { %701 = vmatpush3.bf16.xpose.msra.mxu0 %v700_v44  ;;  %v409_v62 = vadd.f32 %v554_v16, %v408_v61  ;;  %v657_v63 = vpop.f32.mrb[30].mxu1 }
 0x1d8   :  { %702 = vmatprep.subr.bf16.mxu0 %v765_v12  ;;  %v437_v0 = vmax.f32 %v417_v60, 0.0  ;;  %v420_v1 = vadd.f32 %v657_v63, %v554_v16  ;;  %v411_v2 = vpop.f32.mrb[31].mxu1 }
 0x1d9   :  { %v435_v3 = vmax.f32 %v409_v62, 0.0  ;;  %v412_v4 = vadd.f32 %v554_v16, %v411_v2 }
 0x1da   :  { %v438_v5 = vmax.f32 %v420_v1, 0.0 }
 0x1db   :  { %v436_v6 = vmax.f32 %v412_v4, 0.0 }
 0x1dc   :  { %v715_v7 = vpack.c.bf16 %v438_v5, %v437_v0 }
 0x1dd   :  { %v712_v8 = vpack.c.bf16 %v436_v6, %v435_v3 }
 0x1df   :  { %704 = vmatpush3.bf16.xpose.msra.mxu0 %v703_v43 }
 0x1e0   :  { %705 = vmatprep.subr.bf16.mxu0 %v765_v12 }
 0x1e7   :  { %707 = vmatpush3.bf16.xpose.msra.mxu0 %v706_v58 }
 0x1e8   :  { %708 = vmatprep.subr.bf16.mxu0 %v765_v12 }
 0x1ef   :  { %710 = vmatpush3.bf16.xpose.msra.mxu0 %v709_v57 }
 0x1f0   :  { %711 = vmatprep.subr.bf16.mxu0 %v765_v12 }
 0x1f7   :  { %713 = vmatpush3.bf16.xpose.msra.mxu0 %v712_v8 }
 0x1f8   :  { %714 = vmatprep.subr.bf16.mxu0 %v765_v12 }
 0x1ff   :  { %716 = vmatpush3.bf16.xpose.msra.mxu0 %v715_v7 }
 0x206   :  { %691 = vmatmul.mubr.f32.vlgmr.msra.gmra.mrb[0].mxu0 %v439_v9 }
 0x2d9   :  { %v516_v16 = vpop.f32.mrb[0].mxu0 }
 0x2da   :  { %v517_v17 = vadd.f32 %v516_v16, %v449_v15  ;;  %v692_v18 = vpop.f32.mrb[1].mxu0 }
 0x2dc   :  { %520 = vst [vmem:[#allocation3] sm:$0x1] %v517_v17 }
 0x2dd   :  { %752 = shalt.err (!%p749_p4)
}
 0x2de   :  { %s753_s19 = scalar_lea.hbm %s911_s7, 16 }
 0x2df   :  { %p754_p5 = scmp.ne.s32.totalorder %s911_s7, %s753_s19  ;;  %p757_p6 = scmp.lt.u32.totalorder %s753_s19, %s911_s7 }
 0x2e1   :  { %p759_p7 = pnand %p757_p6, %p754_p5 }
 0x2e3   :  { %762 = shalt.err (!%p759_p7)
}
 0x2e4   :  { %530 = dma.vmem_to_hbm [thread:$0]  %s528_s15, 16, %s911_s7, [#allocation4]  }
 0x2e5   :  { %763 = dma.done.wait [#allocation4], 16  }
 0x2e6   :  { %764 = vsyncadd [#allocation4], 4294967280 }
 0x2e7   :  { %534 = vsyncpa [#allocation4], 1 }

</bundles_post_ra>
